<compile_context>
chip_gen: v5e
topology: v5e:2x2
jax: 0.10.0
libtpu: 0.0.40
codegen_flags: <defaults>
</compile_context>

<pallas_src>
import functools

import jax
import jax.numpy as jnp
from jax.experimental import pallas as pl
from jax.experimental.pallas import tpu as pltpu


def _round_up(n: int, m: int) -> int:
    return ((n + m - 1) // m) * m


def _mlp_kernel(x_ref, w1_ref, w2_ref, o_ref):
    # Two MXU matmuls with f32 accumulation + f32 tanh (EUP), all in VMEM.
    x = x_ref[...]
    h = jnp.dot(x, w1_ref[...], preferred_element_type=jnp.float32)   # [Bt, Hp]
    h = jnp.tanh(h)                                                    # f32 tanh
    # Cast back to the weight dtype so a bf16 path still feeds the MXU at
    # bf16 rate; for f32 weights this is a no-op.
    out = jnp.dot(h.astype(w2_ref.dtype), w2_ref[...],
                  preferred_element_type=jnp.float32)                  # [Bt, Op]
    o_ref[...] = out.astype(o_ref.dtype)


@functools.partial(jax.jit, static_argnames=("block_b", "use_bf16"))
def net_forward(x, w1, w2, *, block_b: int = 256, use_bf16: bool = False):
    """tanh(x @ w1) @ w2 with a batch-tiled grid and VMEM-resident weights."""
    B, I = x.shape
    I2, H = w1.shape
    H2, O = w2.shape
    assert I == I2 and H == H2

    out_dtype = x.dtype

    # Lane-dense padding for the hidden and output dims (multiples of 128).
    H_pad = _round_up(H, 128)
    O_pad = _round_up(O, 128)

    # Batch tile: multiple of 8 sublanes, capped at block_b; pad B to a
    # multiple of the tile so every grid step sees a full block.
    b_tile = min(block_b, _round_up(B, 8))
    b_tile = _round_up(b_tile, 8)
    B_pad = _round_up(B, b_tile)
    num_tiles = B_pad // b_tile

    x_p = jnp.pad(x, ((0, B_pad - B), (0, 0)))
    w1_p = jnp.pad(w1, ((0, 0), (0, H_pad - H)))
    w2_p = jnp.pad(w2, ((0, H_pad - H), (0, O_pad - O)))

    if use_bf16:
        # Operands in bf16 (MXU-friendly on v5e/v6e), accumulation stays f32.
        x_p = x_p.astype(jnp.bfloat16)
        w1_p = w1_p.astype(jnp.bfloat16)
        w2_p = w2_p.astype(jnp.bfloat16)

    grid_spec = pl.GridSpec(
        grid=(num_tiles,),
        in_specs=[
            # x tile advances with the grid step.
            pl.BlockSpec((b_tile, I), lambda i: (i, 0)),
            # Weights: same block every step -> DMA'd once, resident in VMEM.
            pl.BlockSpec((I, H_pad), lambda i: (0, 0)),
            pl.BlockSpec((H_pad, O_pad), lambda i: (0, 0)),
        ],
        out_specs=pl.BlockSpec((b_tile, O_pad), lambda i: (i, 0)),
    )

    out_padded = pl.pallas_call(
        _mlp_kernel,
        out_shape=jax.ShapeDtypeStruct((B_pad, O_pad), out_dtype),
        grid_spec=grid_spec,
        compiler_params=pltpu.CompilerParams(
            # Batch tiles are independent -> megacore-shardable on v7x.
            dimension_semantics=("parallel",),
        ),
    )(x_p, w1_p, w2_p)

    # Strip batch / lane padding back to the true output shape.
    return out_padded[:B, :O]


def net_reference(x, w1, w2):
    return jnp.tanh(x @ w1) @ w2


if __name__ == "__main__":
    # Shapes implied by the module: x:[batch, input_size], hidden, output.
    batch, input_size, hidden_size, output_size = 8, 16, 32, 8

    key = jax.random.PRNGKey(0)
    kx, k1, k2 = jax.random.split(key, 3)

    # Deterministic "torch.randn"-style parameter init (synthetic weights).
    x = jax.random.normal(kx, (batch, input_size), dtype=jnp.float32)
    w1 = jax.random.normal(k1, (input_size, hidden_size), dtype=jnp.float32)
    w2 = jax.random.normal(k2, (hidden_size, output_size), dtype=jnp.float32)

    out = jax.block_until_ready(net_forward(x, w1, w2))
    ref = jax.block_until_ready(net_reference(x, w1, w2))

    assert out.shape == (batch, output_size)
    assert jnp.allclose(out, ref, atol=1e-4, rtol=1e-4), "mismatch vs reference"

    # Also exercise the multi-tile path (batch > one tile, non-multiple sizes).
    kx2 = jax.random.fold_in(kx, 1)
    x_big = jax.random.normal(kx2, (300, input_size), dtype=jnp.float32)
    out_big = jax.block_until_ready(net_forward(x_big, w1, w2, block_b=128))
    ref_big = jax.block_until_ready(net_reference(x_big, w1, w2))
    assert out_big.shape == (300, output_size)
    assert jnp.allclose(out_big, ref_big, atol=1e-4, rtol=1e-4), "big-batch mismatch"

    print("KERNEL_OK")
</pallas_src>

<mosaic_0001>
module attributes {stable_mosaic.version = 11 : i64} {
  func.func @_mlp_kernel(%arg0: i32, %arg1: memref<8x16xf32, #tpu.memory_space<vmem>>, %arg2: memref<16x128xf32, #tpu.memory_space<vmem>>, %arg3: memref<128x128xf32, #tpu.memory_space<vmem>>, %arg4: memref<8x128xf32, #tpu.memory_space<vmem>>) attributes {dimension_semantics = [#tpu.dimension_semantics<parallel>], iteration_bounds = array<i64: 1>, scalar_prefetch = 0 : i64, scratch_operands = 0 : i64, tpu.core_type = #tpu.core_type<tc>, window_params = [{transform_indices = @transform_0, window_bounds = array<i64: 8, 16>}, {pipeline_mode = #tpu.pipeline_mode<synchronous>, transform_indices = @transform_1, window_bounds = array<i64: 16, 128>}, {pipeline_mode = #tpu.pipeline_mode<synchronous>, transform_indices = @transform_2, window_bounds = array<i64: 128, 128>}, {transform_indices = @transform_3, window_bounds = array<i64: 8, 128>}]} {
    %c0 = arith.constant 0 : index
    %c0_0 = arith.constant 0 : index
    %0 = vector.load %arg1[%c0, %c0_0] : memref<8x16xf32, #tpu.memory_space<vmem>>, vector<8x16xf32>
    %c0_1 = arith.constant 0 : index
    %c0_2 = arith.constant 0 : index
    %1 = vector.load %arg2[%c0_1, %c0_2] : memref<16x128xf32, #tpu.memory_space<vmem>>, vector<16x128xf32>
    %cst = arith.constant dense<0.000000e+00> : vector<8x128xf32>
    %2 = tpu.matmul %0, %1, %cst {dimension_numbers = #tpu.dot_dimension_numbers<[1], [0], [0], [1], [0, 0, 1, 1], [], []>} : vector<8x16xf32>, vector<16x128xf32>, vector<8x128xf32> -> vector<8x128xf32>
    %3 = math.tanh %2 : vector<8x128xf32>
    %c0_3 = arith.constant 0 : index
    %c0_4 = arith.constant 0 : index
    %4 = vector.load %arg3[%c0_3, %c0_4] : memref<128x128xf32, #tpu.memory_space<vmem>>, vector<128x128xf32>
    %cst_5 = arith.constant dense<0.000000e+00> : vector<8x128xf32>
    %5 = tpu.matmul %3, %4, %cst_5 {dimension_numbers = #tpu.dot_dimension_numbers<[1], [0], [0], [1], [0, 0, 1, 1], [], []>} : vector<8x128xf32>, vector<128x128xf32>, vector<8x128xf32> -> vector<8x128xf32>
    %c0_6 = arith.constant 0 : index
    %c0_7 = arith.constant 0 : index
    %6 = vector.load %arg4[%c0_6, %c0_7] : memref<8x128xf32, #tpu.memory_space<vmem>>, vector<8x128xf32>
    tpu.vector_store %arg4[%c0_6, %c0_7], %5 {strides = array<i32>} : memref<8x128xf32, #tpu.memory_space<vmem>>, vector<8x128xf32>,
    return
  }
  func.func @transform_0(%arg0: i32) -> (i32, i32) {
    %c0_i32 = arith.constant 0 : i32
    %c0_i32_0 = arith.constant 0 : i32
    return %arg0, %c0_i32 : i32, i32
  }
  func.func @transform_1(%arg0: i32) -> (i32, i32) {
    %c0_i32 = arith.constant 0 : i32
    %c0_i32_0 = arith.constant 0 : i32
    %c0_i32_1 = arith.constant 0 : i32
    return %c0_i32, %c0_i32_0 : i32, i32
  }
  func.func @transform_2(%arg0: i32) -> (i32, i32) {
    %c0_i32 = arith.constant 0 : i32
    %c0_i32_0 = arith.constant 0 : i32
    %c0_i32_1 = arith.constant 0 : i32
    return %c0_i32, %c0_i32_0 : i32, i32
  }
  func.func @transform_3(%arg0: i32) -> (i32, i32) {
    %c0_i32 = arith.constant 0 : i32
    %c0_i32_0 = arith.constant 0 : i32
    return %arg0, %c0_i32 : i32, i32
  }
}

</mosaic_0001>

<bundles_post_ra>
// kernel: net_forward.1
= control target key start
LH: loop header
LB: loop body
LE: loop exit
PB: predicated region body
PF: predicated region fallthrough
CT: control target
= control target key end

     0   :  { %vm18_vm0 = vcmask 130048   ;;  %s207_s0 = inlined_call_operand.vmem [shape: f32[8,16], index: 0, kind: input, shape index: {}]   ;;  %s208_s1 = inlined_call_operand.vmem [shape: f32[16,128], index: 1, kind: input, shape index: {}]   ;;  %s209_s2 = inlined_call_operand.vmem [shape: f32[128,128], index: 2, kind: input, shape index: {}]   ;;  %s210_s3 = inlined_call_operand.hbm [shape: f32[8,128], index: 3, kind: output, shape index: {}]  }
   0x1   :  { %v17_v0 = vld [vmem:[%s208_s1 + $0x8] sm:$0xff]  ;;  %v16_v1 = vld [vmem:[%s208_s1] sm:$0xff]  ;;  %v58_v3 = vld [vmem:[%s209_s2 + $0x78] sm:$0xff] }
   0x2   :  { %36 = vmatpush.msra.mxu0 %v17_v0  ;;  %v15_v2 = vld [vmem:[%s207_s0] sm:$0xff]  ;;  %v57_v4 = vld [vmem:[%s209_s2 + $0x70] sm:$0xff]  ;;  %59 = vmatpush.msra.mxu1 %v58_v3  ;;  %v56_v5 = vld [vmem:[%s209_s2 + $0x68] sm:$0xff] }
   0x3   :  { %v55_v6 = vld [vmem:[%s209_s2 + $0x60] sm:$0xff] }
   0x4   :  { %37 = vmatpush.msra.mxu0 %v16_v1  ;;  %60 = vmatpush.msra.mxu1 %v57_v4 }
   0x5   :  { %96 = vmatmul.msk.f32.vlgmr.msra.gmra.mxu0 %vm18_vm0, %v15_v2 }
   0x6   :  { %8 = vsyncpa [#allocation3], 0  ;;  %61 = vmatpush.msra.mxu1 %v56_v5  ;;  %v54_v7 = vld [vmem:[%s209_s2 + $0x58] sm:$0xff]  ;;  %v53_v8 = vld [vmem:[%s209_s2 + $0x50] sm:$0xff]  ;;  %s126_s21 = smov [#allocation2]   ;;  %s87_s24 = sshll.u32 %s210_s3, 4  ;;  %s88_s24 = int_to_ptr.hbm [resolvable:$true] %s87_s24 }
   0x7   :  { %v52_v9 = vld [vmem:[%s209_s2 + $0x48] sm:$0xff]  ;;  %v51_v10 = vld [vmem:[%s209_s2 + $0x40] sm:$0xff]  ;;  %v50_v11 = vld [vmem:[%s209_s2 + $0x38] sm:$0xff]  ;;  %s85_s22 = sshll.u32 %s126_s21, 4  ;;  %s86_s22 = int_to_ptr.vmem [resolvable:$true] %s85_s22 }
   0x8   :  { %62 = vmatpush.msra.mxu1 %v55_v6  ;;  %v49_v12 = vld [vmem:[%s209_s2 + $0x30] sm:$0xff]  ;;  %v48_v13 = vld [vmem:[%s209_s2 + $0x28] sm:$0xff]  ;;  %v47_v14 = vld [vmem:[%s209_s2 + $0x20] sm:$0xff] }
   0x9   :  { %v46_v15 = vld [vmem:[%s209_s2 + $0x18] sm:$0xff]  ;;  %v45_v16 = vld [vmem:[%s209_s2 + $0x10] sm:$0xff]  ;;  %v44_v17 = vld [vmem:[%s209_s2 + $0x8] sm:$0xff] }
   0xa   :  { %63 = vmatpush.msra.mxu1 %v54_v7  ;;  %v43_v18 = vld [vmem:[%s209_s2] sm:$0xff] }
   0xc   :  { %64 = vmatpush.msra.mxu1 %v53_v8 }
   0xe   :  { %65 = vmatpush.msra.mxu1 %v52_v9 }
  0x10   :  { %66 = vmatpush.msra.mxu1 %v51_v10 }
  0x12   :  { %67 = vmatpush.msra.mxu1 %v50_v11 }
  0x14   :  { %68 = vmatpush.msra.mxu1 %v49_v12 }
  0x16   :  { %69 = vmatpush.msra.mxu1 %v48_v13 }
  0x18   :  { %70 = vmatpush.msra.mxu1 %v47_v14 }
  0x1a   :  { %71 = vmatpush.msra.mxu1 %v46_v15 }
  0x1c   :  { %72 = vmatpush.msra.mxu1 %v45_v16 }
  0x1e   :  { %73 = vmatpush.msra.mxu1 %v44_v17 }
  0x20   :  { %74 = vmatpush.msra.mxu1 %v43_v18 }
  0x82   :  { %v39_v19 = vpop.f32.mrf.mxu0 }
  0x83   :  { %98 = vtanh.f32 %v39_v19 }
  0x89   :  { %v99_v20 = vpop.eup %98 }
  0x8a   :  { %75 = vmatmul.f32.vlgmr.msra.gmra.mxu1 %v99_v20 }
 0x107   :  { %v76_v21 = vpop.f32.mrf.mxu1 }
 0x108   :  { %79 = vst [vmem:[#allocation2] sm:$0xff] %v76_v21 }
 0x109   :  { %90 = dma.vmem_to_hbm [thread:$0]  %s86_s22, 128, %s88_s24, [#allocation3]  }
 0x10a   :  { %124 = dma.done.wait [#allocation3], 128  }
 0x10b   :  { %125 = vsyncadd [#allocation3], 4294967168 }
 0x10c   :  { %95 = vsyncpa [#allocation3], 1 }

</bundles_post_ra>
